<compile_context>
chip_gen: v7x
topology: tpu7x:2x2x1
jax: 0.10.0
libtpu: 0.0.40
codegen_flags: <defaults>
</compile_context>

<pallas_src>
import functools

import jax
import jax.numpy as jnp
from jax.experimental import pallas as pl
from jax.experimental.pallas import tpu as pltpu

LANES = 128
SUBLANES = 8
CHUNK_ROWS = 1024          # 1024 * 128 * 4 B = 0.5 MiB f32 temporaries per fold chunk


def _ceil_div(a, b):
    return -(-a // b)


def _tpu_config():
    """Return (target block bytes per input, max TensorCore splits) for this chip."""
    try:
        kind = jax.devices()[0].device_kind.lower()
    except Exception:
        kind = ""
    if "v7" in kind:
        return 4 << 20, 2      # 2 TensorCores per device: shard the reduction axis.
    if "v5 lite" in kind or "v5e" in kind:
        return 2 << 20, 1      # smaller blocks keep 2 inputs x 2 bufs modest on v5e
    return 4 << 20, 1          # v6e and other single-TC chips


def _block_partial_sum(yhat_ref, y_ref, *, chunk_rows, row_start, rows_valid, masked):
    """Fold this block's (tile_rows, 128) squared diff into one (8, 128) vreg.

    Whole-vreg VPU work only; the expensive cross-lane reduce happens once in
    the wrapper. `masked` is a Python bool -> the mask code is only generated
    for the (single) partial last block.
    """
    tile_rows = yhat_ref.shape[0]
    n_chunks = tile_rows // chunk_rows

    def chunk_sum(a, b, chunk_row_start):
        d = a.astype(jnp.float32) - b.astype(jnp.float32)
        dsq = d * d
        if masked:
            row_ids = chunk_row_start + jax.lax.broadcasted_iota(
                jnp.int32, (chunk_rows, LANES), 0)
            dsq = jnp.where(row_ids < rows_valid, dsq, jnp.float32(0.0))
        return jnp.sum(dsq.reshape(chunk_rows // SUBLANES, SUBLANES, LANES), axis=0)

    if n_chunks == 1:
        return chunk_sum(yhat_ref[...], y_ref[...], row_start)

    def body(i, acc):
        r0 = pl.multiple_of(i * chunk_rows, chunk_rows)
        a = yhat_ref[pl.ds(r0, chunk_rows), :]
        b = y_ref[pl.ds(r0, chunk_rows), :]
        return acc + chunk_sum(a, b, row_start + i * chunk_rows)

    return jax.lax.fori_loop(
        0, n_chunks, body, jnp.zeros((SUBLANES, LANES), jnp.float32), unroll=True)


def _sumsq_kernel(yhat_ref, y_ref, out_ref, *, steps_per_core, num_blocks,
                  rows_valid, chunk_rows, last_block_partial, has_clamped_steps):
    """Accumulate per-core partial sums of (yhat - y)^2 into out_ref (1, 8, 128)."""
    c = pl.program_id(0)      # core-split index ("parallel" axis)
    k = pl.program_id(1)      # reduction step ("arbitrary" axis)

    @pl.when(k == 0)
    def _init():
        out_ref[...] = jnp.zeros_like(out_ref)

    tile_rows = yhat_ref.shape[0]
    block_idx = c * steps_per_core + k
    num_full_blocks = num_blocks - 1 if last_block_partial else num_blocks

    def _accum_fast():
        out_ref[...] += _block_partial_sum(
            yhat_ref, y_ref, chunk_rows=chunk_rows, row_start=0,
            rows_valid=rows_valid, masked=False)[None]

    if (not last_block_partial) and (not has_clamped_steps):
        # Every grid step maps to a fully valid block: no predication at all.
        _accum_fast()
    else:
        @pl.when(block_idx < num_full_blocks)
        def _fast():
            _accum_fast()

        if last_block_partial:
            @pl.when(block_idx == num_blocks - 1)
            def _masked():
                out_ref[...] += _block_partial_sum(
                    yhat_ref, y_ref, chunk_rows=chunk_rows,
                    row_start=(num_blocks - 1) * tile_rows,
                    rows_valid=rows_valid, masked=True)[None]
        # block_idx >= num_blocks: clamped duplicate step -> skip compute entirely.


def rmse_loss(yhat, y):
    """sqrt(mean((yhat - y)^2)); matches torch.sqrt(nn.MSELoss()(yhat, y))."""
    assert yhat.shape == y.shape, "yhat and y must have the same shape"
    n = yhat.size
    assert n > 0

    target_bytes, max_core_splits = _tpu_config()

    yhat_flat = jnp.ravel(yhat)
    y_flat = jnp.ravel(y)

    # Align to one whole (8, 128) vreg so the 2-D view is a free reshape.
    # Zero padding contributes 0 to the sum; only unaligned sizes pay this copy.
    min_chunk = SUBLANES * LANES
    padded = _ceil_div(n, min_chunk) * min_chunk
    if padded != n:
        yhat_flat = jnp.pad(yhat_flat, (0, padded - n))
        y_flat = jnp.pad(y_flat, (0, padded - n))

    rows = padded // LANES                      # multiple of 8
    yhat2d = yhat_flat.reshape(rows, LANES)
    y2d = y_flat.reshape(rows, LANES)

    # Dtype-aware block size: constant bytes per grid step (bf16 gets 2x rows).
    itemsize = jnp.dtype(yhat.dtype).itemsize
    budget_rows = max(
        CHUNK_ROWS, (target_bytes // (LANES * itemsize)) // CHUNK_ROWS * CHUNK_ROWS)
    if rows >= CHUNK_ROWS:
        tile_rows = min(budget_rows, (rows // CHUNK_ROWS) * CHUNK_ROWS)
    else:
        tile_rows = rows                        # small input: single tiny block
    chunk_rows = min(CHUNK_ROWS, tile_rows)     # tile_rows % chunk_rows == 0 by construction

    num_blocks = _ceil_div(rows, tile_rows)
    num_core_splits = max(1, min(max_core_splits, num_blocks))
    steps_per_core = _ceil_div(num_blocks, num_core_splits)

    last_block_partial = (rows % tile_rows) != 0
    has_clamped_steps = num_core_splits * steps_per_core > num_blocks

    def in_map(c, k):
        # Clamp a core's trailing out-of-range steps to the last valid block;
        # the kernel skips compute for them, so they never pollute the sum.
        idx = c * steps_per_core + k
        return (jnp.minimum(idx, num_blocks - 1), 0)

    in_spec = pl.BlockSpec((tile_rows, LANES), in_map)
    out_spec = pl.BlockSpec((1, SUBLANES, LANES), lambda c, k: (c, 0, 0))

    # 2 inputs x 2 pipeline buffers + small chunked temporaries + headroom.
    block_bytes = tile_rows * LANES * itemsize
    chunk_f32_bytes = chunk_rows * LANES * 4
    vmem_limit = int(min(max(4 * block_bytes + 8 * chunk_f32_bytes + (4 << 20),
                             16 << 20), 56 << 20))

    cost = pl.CostEstimate(
        flops=3 * n,
        transcendentals=0,
        bytes_accessed=2 * padded * itemsize + num_core_splits * SUBLANES * LANES * 4,
    )

    partials = pl.pallas_call(
        functools.partial(
            _sumsq_kernel,
            steps_per_core=steps_per_core,
            num_blocks=num_blocks,
            rows_valid=rows,
            chunk_rows=chunk_rows,
            last_block_partial=last_block_partial,
            has_clamped_steps=has_clamped_steps),
        out_shape=jax.ShapeDtypeStruct(
            (num_core_splits, SUBLANES, LANES), jnp.float32),
        grid_spec=pltpu.PrefetchScalarGridSpec(
            num_scalar_prefetch=0,
            grid=(num_core_splits, steps_per_core),
            in_specs=[in_spec, in_spec],
            out_specs=out_spec,
        ),
        compiler_params=pltpu.CompilerParams(
            dimension_semantics=("parallel", "arbitrary"),
            vmem_limit_bytes=vmem_limit,
        ),
        cost_estimate=cost,
    )(yhat2d, y2d)

    mse = jnp.sum(partials) / jnp.float32(n)
    # TODO(synk): the PyTorch module's eps is unused in its forward; add `+ eps`
    # under the sqrt only if well-defined gradients at zero loss are required.
    return jnp.sqrt(mse)


if __name__ == "__main__":
    key = jax.random.PRNGKey(0)

    # Primary small test: regression-style (batch=2, seq=8, hidden=32).
    k1, k2 = jax.random.split(key)
    yhat = jax.random.normal(k1, (2, 8, 32), dtype=jnp.float32)
    y = jax.random.normal(k2, (2, 8, 32), dtype=jnp.float32)
    loss = rmse_loss(yhat, y)
    jax.block_until_ready(loss)
    ref = jnp.sqrt(jnp.mean((yhat - y) ** 2))
    assert jnp.allclose(loss, ref, rtol=2e-5, atol=1e-6), (loss, ref)

    # Unaligned size (exercises the pad-to-vreg path).
    k3, k4 = jax.random.split(k1)
    a = jax.random.normal(k3, (5, 13), dtype=jnp.float32)
    b = jax.random.normal(k4, (5, 13), dtype=jnp.float32)
    loss2 = rmse_loss(a, b)
    ref2 = jnp.sqrt(jnp.mean((a - b) ** 2))
    assert jnp.allclose(loss2, ref2, rtol=2e-5, atol=1e-6), (loss2, ref2)

    # Multi-block case with a partial last block (fast path + masked path + clamping).
    k5, k6 = jax.random.split(k2)
    c = jax.random.normal(k5, (9000, 128), dtype=jnp.float32)
    d = jax.random.normal(k6, (9000, 128), dtype=jnp.float32)
    loss3 = rmse_loss(c, d)
    ref3 = jnp.sqrt(jnp.mean((c - d) ** 2))
    assert jnp.allclose(loss3, ref3, rtol=2e-5, atol=1e-6), (loss3, ref3)

    # bf16 inputs (exercises dtype-aware tiling + f32 accumulation).
    k7, k8 = jax.random.split(k3)
    e = jax.random.normal(k7, (2048, 256), dtype=jnp.bfloat16)
    f = jax.random.normal(k8, (2048, 256), dtype=jnp.bfloat16)
    loss4 = rmse_loss(e, f)
    ref4 = jnp.sqrt(jnp.mean(
        (e.astype(jnp.float32) - f.astype(jnp.float32)) ** 2))
    assert jnp.allclose(loss4, ref4, rtol=2e-5, atol=1e-6), (loss4, ref4)

    jax.block_until_ready((loss, loss2, loss3, loss4))
    print("KERNEL_OK")
</pallas_src>

<mosaic_0001>
module attributes {stable_mosaic.version = 11 : i64} {
  func.func @_sumsq_kernel(%arg0: i32, %arg1: i32, %arg2: memref<8x128xf32, #tpu.memory_space<vmem>>, %arg3: memref<8x128xf32, #tpu.memory_space<vmem>>, %arg4: memref<1x8x128xf32, #tpu.memory_space<vmem>>) attributes {dimension_semantics = [#tpu.dimension_semantics<parallel>, #tpu.dimension_semantics<arbitrary>], iteration_bounds = array<i64: 1, 1>, scalar_prefetch = 0 : i64, scratch_operands = 0 : i64, tpu.core_type = #tpu.core_type<tc>, window_params = [{transform_indices = @transform_0, window_bounds = array<i64: 8, 128>}, {transform_indices = @transform_1, window_bounds = array<i64: 8, 128>}, {transform_indices = @transform_2, window_bounds = array<i64: 1, 8, 128>}]} {
    %c0_i32 = arith.constant 0 : i32
    %0 = arith.cmpi eq, %arg1, %c0_i32 : i32
    %1 = arith.extui %0 : i1 to i32
    %c0_i32_0 = arith.constant 0 : i32
    %2 = arith.cmpi ne, %1, %c0_i32_0 : i32
    scf.if %2 {
      %cst_10 = arith.constant 0.000000e+00 : f32
      %13 = vector.broadcast %cst_10 : f32 to vector<1x8x128xf32>
      %c0_11 = arith.constant 0 : index
      %c0_12 = arith.constant 0 : index
      %c0_13 = arith.constant 0 : index
      %14 = vector.load %arg4[%c0_11, %c0_12, %c0_13] : memref<1x8x128xf32, #tpu.memory_space<vmem>>, vector<1x8x128xf32>
      tpu.vector_store %arg4[%c0_11, %c0_12, %c0_13], %13 {strides = array<i32>} : memref<1x8x128xf32, #tpu.memory_space<vmem>>, vector<1x8x128xf32>,
    } else {
    }
    %c0 = arith.constant 0 : index
    %c0_1 = arith.constant 0 : index
    %c0_2 = arith.constant 0 : index
    %3 = vector.load %arg4[%c0, %c0_1, %c0_2] : memref<1x8x128xf32, #tpu.memory_space<vmem>>, vector<1x8x128xf32>
    %c0_3 = arith.constant 0 : index
    %c0_4 = arith.constant 0 : index
    %4 = vector.load %arg2[%c0_3, %c0_4] : memref<8x128xf32, #tpu.memory_space<vmem>>, vector<8x128xf32>
    %c0_5 = arith.constant 0 : index
    %c0_6 = arith.constant 0 : index
    %5 = vector.load %arg3[%c0_5, %c0_6] : memref<8x128xf32, #tpu.memory_space<vmem>>, vector<8x128xf32>
    %6 = arith.subf %4, %5 : vector<8x128xf32>
    %7 = arith.mulf %6, %6 : vector<8x128xf32>
    %8 = vector.shape_cast %7 : vector<8x128xf32> to vector<1x8x128xf32>
    %cst = arith.constant dense<0.000000e+00> : vector<8x128xf32>
    %9 = vector.multi_reduction <add>, %8, %cst [0] : vector<1x8x128xf32> to vector<8x128xf32>
    %10 = vector.shape_cast %9 : vector<8x128xf32> to vector<1x8x128xf32>
    %11 = arith.addf %3, %10 : vector<1x8x128xf32>
    %c0_7 = arith.constant 0 : index
    %c0_8 = arith.constant 0 : index
    %c0_9 = arith.constant 0 : index
    %12 = vector.load %arg4[%c0_7, %c0_8, %c0_9] : memref<1x8x128xf32, #tpu.memory_space<vmem>>, vector<1x8x128xf32>
    tpu.vector_store %arg4[%c0_7, %c0_8, %c0_9], %11 {strides = array<i32>} : memref<1x8x128xf32, #tpu.memory_space<vmem>>, vector<1x8x128xf32>,
    return
  }
  func.func @transform_0(%arg0: i32, %arg1: i32) -> (i32, i32) {
    %c1_i32 = arith.constant 1 : i32
    %0 = arith.muli %arg0, %c1_i32 : i32
    %1 = arith.addi %0, %arg1 : i32
    %c0_i32 = arith.constant 0 : i32
    %2 = arith.minsi %1, %c0_i32 : i32
    %c0_i32_0 = arith.constant 0 : i32
    %c0_i32_1 = arith.constant 0 : i32
    return %2, %c0_i32_0 : i32, i32
  }
  func.func @transform_1(%arg0: i32, %arg1: i32) -> (i32, i32) {
    %c1_i32 = arith.constant 1 : i32
    %0 = arith.muli %arg0, %c1_i32 : i32
    %1 = arith.addi %0, %arg1 : i32
    %c0_i32 = arith.constant 0 : i32
    %2 = arith.minsi %1, %c0_i32 : i32
    %c0_i32_0 = arith.constant 0 : i32
    %c0_i32_1 = arith.constant 0 : i32
    return %2, %c0_i32_0 : i32, i32
  }
  func.func @transform_2(%arg0: i32, %arg1: i32) -> (i32, i32, i32) {
    %c0_i32 = arith.constant 0 : i32
    %c0_i32_0 = arith.constant 0 : i32
    %c0_i32_1 = arith.constant 0 : i32
    return %arg0, %c0_i32, %c0_i32_0 : i32, i32, i32
  }
}

</mosaic_0001>

<bundles_post_ra>
// kernel: tpu_custom_call.1
= control target key start
LH: loop header
LB: loop body
LE: loop exit
PB: predicated region body
PF: predicated region fallthrough
CT: control target
= control target key end

     0   :  { %7 = vsyncpa [#allocation3], 0  ;;  %s215_s0 = inlined_call_operand.hbm [shape: f32[8,128], index: 0, kind: input, shape index: {}]   ;;  %s216_s1 = inlined_call_operand.hbm [shape: f32[8,128], index: 1, kind: input, shape index: {}]   ;;  %s217_s2 = inlined_call_operand.hbm [shape: f32[1,8,128], index: 2, kind: output, shape index: {}]  }
   0x1   :  { %8 = vsyncpa [#allocation6], 0 }
   0x2   :  { %9 = vsyncpa [#allocation4], 0  ;;  %s161_s9 = smov [#allocation2]   ;;  %s162_s11 = smov [#allocation5]  }
   0x3   :  { %s21_s10 = sshll.u32 %s161_s9, 4  ;;  %s36_s12 = sshll.u32 %s162_s11, 4  ;;  %s22_s10 = int_to_ptr.vmem [resolvable:$true] %s21_s10  ;;  %s37_s12 = int_to_ptr.vmem [resolvable:$true] %s36_s12 }
   0x4   :  { %s89_s15 = scalar_lea.hbm %s215_s0, 128 }
   0x5   :  { %p90_p0 = scmp.ne.s32.totalorder %s215_s0, %s89_s15  ;;  %p93_p1 = scmp.lt.u32.totalorder %s89_s15, %s215_s0 }
   0x7   :  { %p95_p2 = pnand %p93_p1, %p90_p0 }
   0x9   :  { %98 = shalt.err (!%p95_p2)
}
   0xa   :  { %s99_s20 = scalar_lea.vmem %s22_s10, 128  ;;  %p104_p4 = scmp.lt.s32.totalorder %s22_s10, %s22_s10 }
   0xb   :  { %p100_p3 = scmp.ne.s32.totalorder %s22_s10, %s99_s20  ;;  %p105_p5 = scmp.lt.s32.totalorder %s99_s20, %s99_s20 }
   0xd   :  { %p106_p6 = por %p105_p5, %p104_p4 }
   0xf   :  { %p107_p7 = pnand %p106_p6, %p100_p3 }
  0x11   :  { %110 = shalt.err (!%p107_p7)
}
  0x12   :  { %24 = dma.hbm_to_vmem [thread:$0]  %s215_s0, 128, %s22_s10, [#allocation3]  }
  0x13   :  { %s111_s25 = scalar_lea.hbm %s216_s1, 128 }
  0x14   :  { %p112_p8 = scmp.ne.s32.totalorder %s216_s1, %s111_s25  ;;  %p115_p9 = scmp.lt.u32.totalorder %s111_s25, %s216_s1 }
  0x16   :  { %p117_p10 = pnand %p115_p9, %p112_p8 }
  0x18   :  { %120 = shalt.err (!%p117_p10)
}
  0x19   :  { %s121_s30 = scalar_lea.vmem %s37_s12, 128  ;;  %p126_p12 = scmp.lt.s32.totalorder %s37_s12, %s37_s12 }
  0x1a   :  { %p122_p11 = scmp.ne.s32.totalorder %s37_s12, %s121_s30  ;;  %p127_p13 = scmp.lt.s32.totalorder %s121_s30, %s121_s30 }
  0x1c   :  { %p128_p0 = por %p127_p13, %p126_p12 }
  0x1e   :  { %p129_p1 = pnand %p128_p0, %p122_p11 }
  0x20   :  { %132 = shalt.err (!%p129_p1)
}
  0x21   :  { %39 = dma.hbm_to_vmem [thread:$0]  %s216_s1, 128, %s37_s12, [#allocation6]  }
  0x22   :  { %155 = dma.done.wait [#allocation3], 128  }
  0x23   :  { %156 = vsyncadd [#allocation3], 4294967168 }
  0x24   :  { %157 = dma.done.wait [#allocation6], 128  }
  0x25   :  { %158 = vsyncadd [#allocation6], 4294967168  ;;  %v58_v0 = vld [vmem:[#allocation2] sm:$0xff]  ;;  %v59_v1 = vld [vmem:[#allocation5] sm:$0xff]  ;;  %s163_s4 = smov [#allocation7]  }
  0x26   :  { %v60_v2 = vsub.f32 %v58_v0, %v59_v1  ;;  %s71_s5 = sshll.u32 %s163_s4, 4  ;;  %s72_s5 = int_to_ptr.vmem [resolvable:$true] %s71_s5 }
  0x27   :  { %s133_s6 = scalar_lea.vmem %s72_s5, 128  ;;  %p138_p3 = scmp.lt.s32.totalorder %s72_s5, %s72_s5 }
  0x28   :  { %v61_v3 = vmul.f32 %v60_v2, %v60_v2  ;;  %p134_p2 = scmp.ne.s32.totalorder %s72_s5, %s133_s6  ;;  %p139_p4 = scmp.lt.s32.totalorder %s133_s6, %s133_s6 }
  0x2a   :  { %64 = vst [vmem:[#allocation7] sm:$0xff] %v61_v3  ;;  %p140_p5 = por %p139_p4, %p138_p3 }
  0x2c   :  { %p141_p6 = pnand %p140_p5, %p134_p2 }
  0x2e   :  { %144 = shalt.err (!%p141_p6)
}
  0x2f   :  { %s145_s8 = scalar_lea.hbm %s217_s2, 128 }
  0x30   :  { %p146_p7 = scmp.ne.s32.totalorder %s217_s2, %s145_s8  ;;  %p149_p8 = scmp.lt.u32.totalorder %s145_s8, %s217_s2 }
  0x32   :  { %p151_p9 = pnand %p149_p8, %p146_p7 }
  0x34   :  { %154 = shalt.err (!%p151_p9)
}
  0x35   :  { %74 = dma.vmem_to_hbm [thread:$0]  %s72_s5, 128, %s217_s2, [#allocation4]  }
  0x36   :  { %159 = dma.done.wait [#allocation4], 128  }
  0x37   :  { %160 = vsyncadd [#allocation4], 4294967168 }
  0x38   :  { %78 = vsyncpa [#allocation3], 1 }
  0x39   :  { %79 = vsyncpa [#allocation6], 1 }
  0x3a   :  { %80 = vsyncpa [#allocation4], 1 }

</bundles_post_ra>
